<compile_context>
chip_gen: v5e
topology: v5e:2x2
jax: 0.10.0
libtpu: 0.0.40
codegen_flags: <defaults>
</compile_context>

<pallas_src>
import jax
import jax.numpy as jnp
from jax.experimental import pallas as pl
from jax.experimental.pallas import tpu as pltpu


# ----------------------------------------------------------------------------
# Pallas kernel: the whole forward pass (3 matmuls + biases + ReLU + Sigmoid)
# fused in one body; the grid tiles over the batch dimension only, weights /
# biases are grid-invariant blocks (same block every step -> stay in VMEM).
# ----------------------------------------------------------------------------
def _mlp_kernel(x_ref, w1_ref, b1_ref, w2_ref, b2_ref, w3_ref, b3_ref, o_ref):
    # Layer 1: Linear(D_in -> H1) + ReLU.
    h = jnp.dot(x_ref[...], w1_ref[...],
                preferred_element_type=jnp.float32) + b1_ref[...]
    h = jnp.maximum(h, 0.0)

    # Layer 2: Linear(H1 -> H2) + ReLU (tiny — stays fused, no tiling).
    h = jnp.dot(h, w2_ref[...], preferred_element_type=jnp.float32) + b2_ref[...]
    h = jnp.maximum(h, 0.0)

    # Layer 3: Linear(H2 -> D_out) + Sigmoid.
    h = jnp.dot(h, w3_ref[...], preferred_element_type=jnp.float32) + b3_ref[...]
    o_ref[...] = jax.nn.sigmoid(h).astype(o_ref.dtype)


# ----------------------------------------------------------------------------
# Tiling helpers.
# ----------------------------------------------------------------------------
_MAX_TILE = 1024  # ~8 MB of f32 x rows per buffer at D_in=2000


def _round_up(x, m):
    return ((x + m - 1) // m) * m


def _num_tensorcores():
    """Number of TensorCores a single Pallas 'parallel' grid can shard over."""
    try:
        kind = jax.devices()[0].device_kind.lower()
    except Exception:
        return 1
    # v7x has 2 TCs per chip; v4/v5p expose 2 cores as a megacore.
    if "v7" in kind or "v4" in kind or "v5p" in kind:
        return 2
    return 1


def _pick_batch_tile(B, num_tc):
    """Pick a row tile: big enough to amortize per-grid-step overhead, small
    enough to fit VMEM, and (on multi-TC chips) yielding >= num_tc steps so
    the parallel grid axis actually uses both cores."""
    if num_tc > 1 and B >= 64:
        tile = min(_MAX_TILE, _round_up(pl.cdiv(B, num_tc), 8))
    else:
        tile = min(_MAX_TILE, B)
    if tile >= B:
        return B                       # single step, no padding needed
    return _round_up(tile, 8)          # f32 sublane rule for sub-blocks


# ----------------------------------------------------------------------------
# Wrapper.
# ----------------------------------------------------------------------------
def cell_type_classifier_forward(x, params, *, batch_tile=None):
    """Fused MLP forward pass. x: [B, D_in] f32, params: list of (W, b) with
    W stored as (in, out) and b as (1, out)."""
    (w1, b1), (w2, b2), (w3, b3) = params
    B, D_in = x.shape
    H1 = w1.shape[1]
    H2 = w2.shape[1]
    D_out = w3.shape[1]

    if batch_tile is None:
        batch_tile = _pick_batch_tile(B, _num_tensorcores())
    batch_tile = min(batch_tile, B) if batch_tile >= B else batch_tile
    if batch_tile < B:
        assert batch_tile % 8 == 0, "sub-batch tile must be a multiple of 8 (f32)"

    # Pad the batch up to a multiple of the tile; slice the result back.
    n_steps = pl.cdiv(B, batch_tile)
    B_pad = n_steps * batch_tile
    x_in = x if B_pad == B else jnp.pad(x, ((0, B_pad - B), (0, 0)))

    grid = (n_steps,)

    # Weights / biases: same full block for every grid step (grid-invariant,
    # so Pallas keeps them resident instead of re-DMA-ing them per step).
    def bcast2d(shape):
        return pl.BlockSpec(shape, lambda i: (0, 0))

    # Advisory cost estimate (HBM-bound on streaming x).
    weight_elems = D_in * H1 + H1 + H1 * H2 + H2 + H2 * D_out + D_out
    cost = pl.CostEstimate(
        flops=2 * B_pad * (D_in * H1 + H1 * H2 + H2 * D_out),
        transcendentals=B_pad * D_out,                 # sigmoid
        bytes_accessed=4 * (B_pad * D_in + weight_elems + B_pad * D_out),
    )

    # Bump scoped VMEM only if this tile would exceed the default limit
    # (double-buffered x/out + resident weights + intermediates).
    vmem_need = (4 * weight_elems
                 + 4 * batch_tile * (2 * D_in + 2 * D_out + 2 * max(H1, H2)))
    compiler_kwargs = dict(dimension_semantics=("parallel",))
    if vmem_need > (28 << 20):
        compiler_kwargs["vmem_limit_bytes"] = min(vmem_need + (8 << 20), 100 << 20)

    out = pl.pallas_call(
        _mlp_kernel,
        out_shape=jax.ShapeDtypeStruct((B_pad, D_out), jnp.float32),
        grid_spec=pltpu.PrefetchScalarGridSpec(
            num_scalar_prefetch=0,
            grid=grid,
            in_specs=[
                pl.BlockSpec((batch_tile, D_in), lambda i: (i, 0)),  # x (f32)
                bcast2d((D_in, H1)),   # W1
                bcast2d((1, H1)),      # b1
                bcast2d((H1, H2)),     # W2
                bcast2d((1, H2)),      # b2
                bcast2d((H2, D_out)),  # W3
                bcast2d((1, D_out)),   # b3
            ],
            out_specs=pl.BlockSpec((batch_tile, D_out), lambda i: (i, 0)),
        ),
        compiler_params=pltpu.CompilerParams(**compiler_kwargs),
        cost_estimate=cost,
    )(x_in, w1, b1, w2, b2, w3, b3)

    return out if B_pad == B else out[:B]


# ----------------------------------------------------------------------------
# Deterministic parameter init (mirrors nn.Linear's U(-1/sqrt(fan_in), ...)).
# ----------------------------------------------------------------------------
def init_params(key, layers):
    params = []
    for (fan_in, fan_out) in layers:
        key, kw, kb = jax.random.split(key, 3)
        bound = 1.0 / jnp.sqrt(float(fan_in))
        # Stored as (in, out) == PyTorch weight (out, in) transposed.
        w = jax.random.uniform(kw, (fan_in, fan_out), jnp.float32, -bound, bound)
        b = jax.random.uniform(kb, (1, fan_out), jnp.float32, -bound, bound)
        params.append((w, b))
    return params


def reference_forward(x, params):
    """Pure-JAX f32 reference of the PyTorch module's forward."""
    h = x
    for i, (w, b) in enumerate(params):
        h = jnp.dot(h, w, preferred_element_type=jnp.float32) + b
        if i == len(params) - 1:
            h = jax.nn.sigmoid(h)
        else:
            h = jnp.maximum(h, 0.0)
    return h


if __name__ == "__main__":
    # Default module spec: layers=((2000, 12), (12, 8), (8, 1)).
    layers = ((2000, 12), (12, 8), (8, 1))

    key = jax.random.PRNGKey(0)
    key, kx1, kx2 = jax.random.split(key, 3)
    params = init_params(key, layers)

    # --- Test 1: small batch (auto tile; grid=(1,) on 1-TC chips). ---------
    B1 = 16
    x1 = jax.random.normal(kx1, (B1, layers[0][0]), jnp.float32)
    out1 = jax.block_until_ready(cell_type_classifier_forward(x1, params))
    assert out1.shape == (B1, layers[-1][1])
    ref1 = jax.block_until_ready(reference_forward(x1, params))
    assert jnp.allclose(out1, ref1, atol=1e-3, rtol=1e-3), \
        "mismatch vs JAX reference (small batch)"

    # --- Test 2: batch not divisible by the tile (exercises padding path). --
    B2 = 200
    x2 = jax.random.normal(kx2, (B2, layers[0][0]), jnp.float32)
    out2 = jax.block_until_ready(
        cell_type_classifier_forward(x2, params, batch_tile=64))
    assert out2.shape == (B2, layers[-1][1])
    ref2 = jax.block_until_ready(reference_forward(x2, params))
    assert jnp.allclose(out2, ref2, atol=1e-3, rtol=1e-3), \
        "mismatch vs JAX reference (padded multi-step batch)"

    print("KERNEL_OK")
</pallas_src>

<mosaic_0001>
module attributes {stable_mosaic.version = 11 : i64} {
  func.func @_mlp_kernel(%arg0: i32, %arg1: memref<16x2000xf32, #tpu.memory_space<vmem>>, %arg2: memref<2000x12xf32, #tpu.memory_space<vmem>>, %arg3: memref<1x12xf32, #tpu.memory_space<vmem>>, %arg4: memref<12x8xf32, #tpu.memory_space<vmem>>, %arg5: memref<1x8xf32, #tpu.memory_space<vmem>>, %arg6: memref<8x1xf32, #tpu.memory_space<vmem>>, %arg7: memref<1x1xf32, #tpu.memory_space<vmem>>, %arg8: memref<16x1xf32, #tpu.memory_space<vmem>>) attributes {dimension_semantics = [#tpu.dimension_semantics<parallel>], iteration_bounds = array<i64: 1>, scalar_prefetch = 0 : i64, scratch_operands = 0 : i64, tpu.core_type = #tpu.core_type<tc>, window_params = [{transform_indices = @transform_0, window_bounds = array<i64: 16, 2000>}, {pipeline_mode = #tpu.pipeline_mode<synchronous>, transform_indices = @transform_1, window_bounds = array<i64: 2000, 12>}, {pipeline_mode = #tpu.pipeline_mode<synchronous>, transform_indices = @transform_2, window_bounds = array<i64: 1, 12>}, {pipeline_mode = #tpu.pipeline_mode<synchronous>, transform_indices = @transform_3, window_bounds = array<i64: 12, 8>}, {pipeline_mode = #tpu.pipeline_mode<synchronous>, transform_indices = @transform_4, window_bounds = array<i64: 1, 8>}, {pipeline_mode = #tpu.pipeline_mode<synchronous>, transform_indices = @transform_5, window_bounds = array<i64: 8, 1>}, {pipeline_mode = #tpu.pipeline_mode<synchronous>, transform_indices = @transform_6, window_bounds = array<i64: 1, 1>}, {transform_indices = @transform_7, window_bounds = array<i64: 16, 1>}]} {
    %c0 = arith.constant 0 : index
    %c0_0 = arith.constant 0 : index
    %0 = vector.load %arg1[%c0, %c0_0] : memref<16x2000xf32, #tpu.memory_space<vmem>>, vector<16x2000xf32>
    %c0_1 = arith.constant 0 : index
    %c0_2 = arith.constant 0 : index
    %1 = vector.load %arg2[%c0_1, %c0_2] : memref<2000x12xf32, #tpu.memory_space<vmem>>, vector<2000x12xf32>
    %cst = arith.constant dense<0.000000e+00> : vector<16x12xf32>
    %2 = tpu.matmul %0, %1, %cst {dimension_numbers = #tpu.dot_dimension_numbers<[1], [0], [0], [1], [0, 0, 1, 1], [], []>} : vector<16x2000xf32>, vector<2000x12xf32>, vector<16x12xf32> -> vector<16x12xf32>
    %c0_3 = arith.constant 0 : index
    %c0_4 = arith.constant 0 : index
    %3 = vector.load %arg3[%c0_3, %c0_4] : memref<1x12xf32, #tpu.memory_space<vmem>>, vector<1x12xf32>
    %4 = vector.broadcast %3 : vector<1x12xf32> to vector<16x12xf32>
    %5 = arith.addf %2, %4 : vector<16x12xf32>
    %cst_5 = arith.constant 0.000000e+00 : f32
    %6 = vector.broadcast %cst_5 : f32 to vector<16x12xf32>
    %7 = arith.maximumf %5, %6 : vector<16x12xf32>
    %c0_6 = arith.constant 0 : index
    %c0_7 = arith.constant 0 : index
    %8 = vector.load %arg4[%c0_6, %c0_7] : memref<12x8xf32, #tpu.memory_space<vmem>>, vector<12x8xf32>
    %cst_8 = arith.constant dense<0.000000e+00> : vector<16x8xf32>
    %9 = tpu.matmul %7, %8, %cst_8 {dimension_numbers = #tpu.dot_dimension_numbers<[1], [0], [0], [1], [0, 0, 1, 1], [], []>} : vector<16x12xf32>, vector<12x8xf32>, vector<16x8xf32> -> vector<16x8xf32>
    %c0_9 = arith.constant 0 : index
    %c0_10 = arith.constant 0 : index
    %10 = vector.load %arg5[%c0_9, %c0_10] : memref<1x8xf32, #tpu.memory_space<vmem>>, vector<1x8xf32>
    %11 = vector.broadcast %10 : vector<1x8xf32> to vector<16x8xf32>
    %12 = arith.addf %9, %11 : vector<16x8xf32>
    %cst_11 = arith.constant 0.000000e+00 : f32
    %13 = vector.broadcast %cst_11 : f32 to vector<16x8xf32>
    %14 = arith.maximumf %12, %13 : vector<16x8xf32>
    %c0_12 = arith.constant 0 : index
    %c0_13 = arith.constant 0 : index
    %15 = vector.load %arg6[%c0_12, %c0_13] : memref<8x1xf32, #tpu.memory_space<vmem>>, vector<8x1xf32>
    %cst_14 = arith.constant dense<0.000000e+00> : vector<16x1xf32>
    %16 = tpu.matmul %14, %15, %cst_14 {dimension_numbers = #tpu.dot_dimension_numbers<[1], [0], [0], [1], [0, 0, 1, 1], [], []>} : vector<16x8xf32>, vector<8x1xf32>, vector<16x1xf32> -> vector<16x1xf32>
    %c0_15 = arith.constant 0 : index
    %c0_16 = arith.constant 0 : index
    %17 = vector.load %arg7[%c0_15, %c0_16] : memref<1x1xf32, #tpu.memory_space<vmem>>, vector<1x1xf32>
    %18 = vector.broadcast %17 : vector<1x1xf32> to vector<16x1xf32>
    %19 = arith.addf %16, %18 : vector<16x1xf32>
    %20 = arith.negf %19 : vector<16x1xf32>
    %21 = math.exp %20 : vector<16x1xf32>
    %cst_17 = arith.constant 1.000000e+00 : f32
    %22 = vector.broadcast %cst_17 : f32 to vector<16x1xf32>
    %23 = arith.addf %22, %21 : vector<16x1xf32>
    %24 = arith.divf %22, %23 : vector<16x1xf32>
    %c0_18 = arith.constant 0 : index
    %c0_19 = arith.constant 0 : index
    %25 = vector.load %arg8[%c0_18, %c0_19] : memref<16x1xf32, #tpu.memory_space<vmem>>, vector<16x1xf32>
    tpu.vector_store %arg8[%c0_18, %c0_19], %24 {strides = array<i32>} : memref<16x1xf32, #tpu.memory_space<vmem>>, vector<16x1xf32>,
    return
  }
  func.func @transform_0(%arg0: i32) -> (i32, i32) {
    %c0_i32 = arith.constant 0 : i32
    %c0_i32_0 = arith.constant 0 : i32
    return %arg0, %c0_i32 : i32, i32
  }
  func.func @transform_1(%arg0: i32) -> (i32, i32) {
    %c0_i32 = arith.constant 0 : i32
    %c0_i32_0 = arith.constant 0 : i32
    %c0_i32_1 = arith.constant 0 : i32
    return %c0_i32, %c0_i32_0 : i32, i32
  }
  func.func @transform_2(%arg0: i32) -> (i32, i32) {
    %c0_i32 = arith.constant 0 : i32
    %c0_i32_0 = arith.constant 0 : i32
    %c0_i32_1 = arith.constant 0 : i32
    return %c0_i32, %c0_i32_0 : i32, i32
  }
  func.func @transform_3(%arg0: i32) -> (i32, i32) {
    %c0_i32 = arith.constant 0 : i32
    %c0_i32_0 = arith.constant 0 : i32
    %c0_i32_1 = arith.constant 0 : i32
    return %c0_i32, %c0_i32_0 : i32, i32
  }
  func.func @transform_4(%arg0: i32) -> (i32, i32) {
    %c0_i32 = arith.constant 0 : i32
    %c0_i32_0 = arith.constant 0 : i32
    %c0_i32_1 = arith.constant 0 : i32
    return %c0_i32, %c0_i32_0 : i32, i32
  }
  func.func @transform_5(%arg0: i32) -> (i32, i32) {
    %c0_i32 = arith.constant 0 : i32
    %c0_i32_0 = arith.constant 0 : i32
    %c0_i32_1 = arith.constant 0 : i32
    return %c0_i32, %c0_i32_0 : i32, i32
  }
  func.func @transform_6(%arg0: i32) -> (i32, i32) {
    %c0_i32 = arith.constant 0 : i32
    %c0_i32_0 = arith.constant 0 : i32
    %c0_i32_1 = arith.constant 0 : i32
    return %c0_i32, %c0_i32_0 : i32, i32
  }
  func.func @transform_7(%arg0: i32) -> (i32, i32) {
    %c0_i32 = arith.constant 0 : i32
    %c0_i32_0 = arith.constant 0 : i32
    return %arg0, %c0_i32 : i32, i32
  }
}

</mosaic_0001>

<bundles_post_ra>
// kernel: tpu_custom_call.1
= control target key start
LH: loop header
LB: loop body
LE: loop exit
PB: predicated region body
PF: predicated region fallthrough
CT: control target
= control target key end

     0   :  { %vm314_vm0 = vcmask 654336   ;;  %vm704_vm1 = vcmask 1043456   ;;  %vm697_vm2 = vcmask 97280   ;;  %vm738_vm3 = vcmask 64512   ;;  %s1748_s1 = inlined_call_operand.vmem [shape: f32[2000,12], index: 1, kind: input, shape index: {}]   ;;  %s1749_s0 = inlined_call_operand.vmem [shape: f32[16,2000], index: 0, kind: input, shape index: {}]   ;;  %s1750_s2 = inlined_call_operand.vmem [shape: f32[1,12], index: 2, kind: input, shape index: {}]   ;;  %s1751_s4 = inlined_call_operand.vmem [shape: f32[1,8], index: 4, kind: input, shape index: {}]   ;;  %s1752_s3 = inlined_call_operand.vmem [shape: f32[12,8], index: 3, kind: input, shape index: {}]   ;;  %s1753_s5 = inlined_call_operand.vmem [shape: f32[8,1], index: 5, kind: input, shape index: {}]   ;;  %s1754_s6 = inlined_call_operand.<no memory space> [shape: f32[1,1], index: 6, kind: input, shape index: {}]   ;;  %s1755_s7 = inlined_call_operand.vmem [shape: f32[16,1], index: 7, kind: output, shape index: {}]  }
   0x1   :  { %v75_v0 = vld [vmem:[%s1748_s1 + $0x78] sm:$0xff]  ;;  %v74_v2 = vld [vmem:[%s1748_s1 + $0x70] sm:$0xff]  ;;  %v73_v6 = vld [vmem:[%s1748_s1 + $0x68] sm:$0xff]  ;;  %vm806_vm7 = vcmask 7168  }
   0x2   :  { %v107_v1 = vld [vmem:[%s1748_s1 + $0x178] sm:$0xff]  ;;  %321 = vmatpush.msra.mxu0 %v75_v0  ;;  %v106_v4 = vld [vmem:[%s1748_s1 + $0x170] sm:$0xff]  ;;  %v105_v8 = vld [vmem:[%s1748_s1 + $0x168] sm:$0xff] }
   0x3   :  { %367 = vmatpush.msra.mxu2 %v107_v1  ;;  %v91_v3 = vld [vmem:[%s1748_s1 + $0xf8] sm:$0xff]  ;;  %v90_v7 = vld [vmem:[%s1748_s1 + $0xf0] sm:$0xff]  ;;  %v89_v10 = vld [vmem:[%s1748_s1 + $0xe8] sm:$0xff] }
   0x4   :  { %v123_v5 = vld [vmem:[%s1748_s1 + $0x1f8] sm:$0xff]  ;;  %344 = vmatpush.msra.mxu1 %v91_v3  ;;  %322 = vmatpush.msra.mxu0 %v74_v2  ;;  %v122_v9 = vld [vmem:[%s1748_s1 + $0x1f0] sm:$0xff]  ;;  %v72_v11 = vld [vmem:[%s1748_s1 + $0x60] sm:$0xff] }
   0x5   :  { %390 = vmatpush.msra.mxu3 %v123_v5  ;;  %368 = vmatpush.msra.mxu2 %v106_v4  ;;  %v104_v12 = vld [vmem:[%s1748_s1 + $0x160] sm:$0xff]  ;;  %v121_v13 = vld [vmem:[%s1748_s1 + $0x1e8] sm:$0xff]  ;;  %v71_v16 = vld [vmem:[%s1748_s1 + $0x58] sm:$0xff] }
   0x6   :  { %345 = vmatpush.msra.mxu1 %v90_v7  ;;  %323 = vmatpush.msra.mxu0 %v73_v6  ;;  %v88_v14 = vld [vmem:[%s1748_s1 + $0xe0] sm:$0xff]  ;;  %v103_v17 = vld [vmem:[%s1748_s1 + $0x158] sm:$0xff]  ;;  %v70_v20 = vld [vmem:[%s1748_s1 + $0x50] sm:$0xff] }
   0x7   :  { %391 = vmatpush.msra.mxu3 %v122_v9  ;;  %369 = vmatpush.msra.mxu2 %v105_v8  ;;  %v120_v15 = vld [vmem:[%s1748_s1 + $0x1e0] sm:$0xff]  ;;  %v87_v18 = vld [vmem:[%s1748_s1 + $0xd8] sm:$0xff]  ;;  %v102_v21 = vld [vmem:[%s1748_s1 + $0x150] sm:$0xff] }
   0x8   :  { %346 = vmatpush.msra.mxu1 %v89_v10  ;;  %324 = vmatpush.msra.mxu0 %v72_v11  ;;  %v119_v19 = vld [vmem:[%s1748_s1 + $0x1d8] sm:$0xff]  ;;  %v86_v22 = vld [vmem:[%s1748_s1 + $0xd0] sm:$0xff]  ;;  %v69_v24 = vld [vmem:[%s1748_s1 + $0x48] sm:$0xff] }
   0x9   :  { %392 = vmatpush.msra.mxu3 %v121_v13  ;;  %370 = vmatpush.msra.mxu2 %v104_v12  ;;  %v118_v23 = vld [vmem:[%s1748_s1 + $0x1d0] sm:$0xff]  ;;  %v101_v25 = vld [vmem:[%s1748_s1 + $0x148] sm:$0xff]  ;;  %v68_v28 = vld [vmem:[%s1748_s1 + $0x40] sm:$0xff] }
   0xa   :  { %347 = vmatpush.msra.mxu1 %v88_v14  ;;  %325 = vmatpush.msra.mxu0 %v71_v16  ;;  %v85_v26 = vld [vmem:[%s1748_s1 + $0xc8] sm:$0xff]  ;;  %v100_v29 = vld [vmem:[%s1748_s1 + $0x140] sm:$0xff]  ;;  %v67_v32 = vld [vmem:[%s1748_s1 + $0x38] sm:$0xff] }
   0xb   :  { %393 = vmatpush.msra.mxu3 %v120_v15  ;;  %371 = vmatpush.msra.mxu2 %v103_v17  ;;  %v117_v27 = vld [vmem:[%s1748_s1 + $0x1c8] sm:$0xff]  ;;  %v84_v30 = vld [vmem:[%s1748_s1 + $0xc0] sm:$0xff]  ;;  %v99_v33 = vld [vmem:[%s1748_s1 + $0x138] sm:$0xff] }
   0xc   :  { %348 = vmatpush.msra.mxu1 %v87_v18  ;;  %326 = vmatpush.msra.mxu0 %v70_v20  ;;  %v116_v31 = vld [vmem:[%s1748_s1 + $0x1c0] sm:$0xff]  ;;  %v83_v34 = vld [vmem:[%s1748_s1 + $0xb8] sm:$0xff]  ;;  %v66_v36 = vld [vmem:[%s1748_s1 + $0x30] sm:$0xff] }
   0xd   :  { %394 = vmatpush.msra.mxu3 %v119_v19  ;;  %372 = vmatpush.msra.mxu2 %v102_v21  ;;  %v115_v35 = vld [vmem:[%s1748_s1 + $0x1b8] sm:$0xff]  ;;  %v98_v37 = vld [vmem:[%s1748_s1 + $0x130] sm:$0xff]  ;;  %v65_v40 = vld [vmem:[%s1748_s1 + $0x28] sm:$0xff] }
   0xe   :  { %349 = vmatpush.msra.mxu1 %v86_v22  ;;  %327 = vmatpush.msra.mxu0 %v69_v24  ;;  %v82_v38 = vld [vmem:[%s1748_s1 + $0xb0] sm:$0xff]  ;;  %v97_v41 = vld [vmem:[%s1748_s1 + $0x128] sm:$0xff]  ;;  %v64_v44 = vld [vmem:[%s1748_s1 + $0x20] sm:$0xff] }
   0xf   :  { %395 = vmatpush.msra.mxu3 %v118_v23  ;;  %373 = vmatpush.msra.mxu2 %v101_v25  ;;  %v114_v39 = vld [vmem:[%s1748_s1 + $0x1b0] sm:$0xff]  ;;  %v81_v42 = vld [vmem:[%s1748_s1 + $0xa8] sm:$0xff]  ;;  %v96_v45 = vld [vmem:[%s1748_s1 + $0x120] sm:$0xff] }
  0x10   :  { %350 = vmatpush.msra.mxu1 %v85_v26  ;;  %328 = vmatpush.msra.mxu0 %v68_v28  ;;  %v113_v43 = vld [vmem:[%s1748_s1 + $0x1a8] sm:$0xff]  ;;  %v80_v46 = vld [vmem:[%s1748_s1 + $0xa0] sm:$0xff]  ;;  %v63_v48 = vld [vmem:[%s1748_s1 + $0x18] sm:$0xff] }
  0x11   :  { %396 = vmatpush.msra.mxu3 %v117_v27  ;;  %374 = vmatpush.msra.mxu2 %v100_v29  ;;  %v112_v47 = vld [vmem:[%s1748_s1 + $0x1a0] sm:$0xff]  ;;  %v95_v49 = vld [vmem:[%s1748_s1 + $0x118] sm:$0xff]  ;;  %v62_v52 = vld [vmem:[%s1748_s1 + $0x10] sm:$0xff] }
  0x12   :  { %351 = vmatpush.msra.mxu1 %v84_v30  ;;  %329 = vmatpush.msra.mxu0 %v67_v32  ;;  %v79_v50 = vld [vmem:[%s1748_s1 + $0x98] sm:$0xff]  ;;  %v94_v53 = vld [vmem:[%s1748_s1 + $0x110] sm:$0xff]  ;;  %v61_v56 = vld [vmem:[%s1748_s1 + $0x8] sm:$0xff] }
  0x13   :  { %397 = vmatpush.msra.mxu3 %v116_v31  ;;  %375 = vmatpush.msra.mxu2 %v99_v33  ;;  %v111_v51 = vld [vmem:[%s1748_s1 + $0x198] sm:$0xff]  ;;  %v78_v54 = vld [vmem:[%s1748_s1 + $0x90] sm:$0xff]  ;;  %v93_v57 = vld [vmem:[%s1748_s1 + $0x108] sm:$0xff] }
  0x14   :  { %352 = vmatpush.msra.mxu1 %v83_v34  ;;  %330 = vmatpush.msra.mxu0 %v66_v36  ;;  %v110_v55 = vld [vmem:[%s1748_s1 + $0x190] sm:$0xff]  ;;  %v77_v58 = vld [vmem:[%s1748_s1 + $0x88] sm:$0xff]  ;;  %v60_v60 = vld [vmem:[%s1748_s1] sm:$0xff] }
  0x15   :  { %398 = vmatpush.msra.mxu3 %v115_v35  ;;  %376 = vmatpush.msra.mxu2 %v98_v37  ;;  %v109_v59 = vld [vmem:[%s1748_s1 + $0x188] sm:$0xff]  ;;  %v92_v61 = vld [vmem:[%s1748_s1 + $0x100] sm:$0xff]  ;;  %v139_v62 = vld [vmem:[%s1748_s1 + $0x278] sm:$0xff] }
  0x16   :  { %353 = vmatpush.msra.mxu1 %v82_v38  ;;  %331 = vmatpush.msra.mxu0 %v65_v40  ;;  %v171_v63 = vld [vmem:[%s1748_s1 + $0x378] sm:$0xff]  ;;  %v76_v0 = vld [vmem:[%s1748_s1 + $0x80] sm:$0xff]  ;;  %v138_v2 = vld [vmem:[%s1748_s1 + $0x270] sm:$0xff] }
  0x17   :  { %399 = vmatpush.msra.mxu3 %v114_v39  ;;  %377 = vmatpush.msra.mxu2 %v97_v41  ;;  %v108_v1 = vld [vmem:[%s1748_s1 + $0x180] sm:$0xff]  ;;  %v155_v3 = vld [vmem:[%s1748_s1 + $0x2f8] sm:$0xff]  ;;  %v170_v4 = vld [vmem:[%s1748_s1 + $0x370] sm:$0xff] }
  0x18   :  { %354 = vmatpush.msra.mxu1 %v81_v42  ;;  %332 = vmatpush.msra.mxu0 %v64_v44  ;;  %v187_v5 = vld [vmem:[%s1748_s1 + $0x3f8] sm:$0xff]  ;;  %v137_v6 = vld [vmem:[%s1748_s1 + $0x268] sm:$0xff]  ;;  %v154_v7 = vld [vmem:[%s1748_s1 + $0x2f0] sm:$0xff] }
  0x19   :  { %400 = vmatpush.msra.mxu3 %v113_v43  ;;  %378 = vmatpush.msra.mxu2 %v96_v45  ;;  %v169_v8 = vld [vmem:[%s1748_s1 + $0x368] sm:$0xff]  ;;  %v186_v9 = vld [vmem:[%s1748_s1 + $0x3f0] sm:$0xff]  ;;  %v136_v10 = vld [vmem:[%s1748_s1 + $0x260] sm:$0xff] }
  0x1a   :  { %355 = vmatpush.msra.mxu1 %v80_v46  ;;  %333 = vmatpush.msra.mxu0 %v63_v48  ;;  %v153_v11 = vld [vmem:[%s1748_s1 + $0x2e8] sm:$0xff]  ;;  %v168_v12 = vld [vmem:[%s1748_s1 + $0x360] sm:$0xff]  ;;  %v135_v14 = vld [vmem:[%s1748_s1 + $0x258] sm:$0xff] }
  0x1b   :  { %401 = vmatpush.msra.mxu3 %v112_v47  ;;  %379 = vmatpush.msra.mxu2 %v95_v49  ;;  %v185_v13 = vld [vmem:[%s1748_s1 + $0x3e8] sm:$0xff]  ;;  %v152_v15 = vld [vmem:[%s1748_s1 + $0x2e0] sm:$0xff]  ;;  %v167_v16 = vld [vmem:[%s1748_s1 + $0x358] sm:$0xff] }
  0x1c   :  { %356 = vmatpush.msra.mxu1 %v79_v50  ;;  %334 = vmatpush.msra.mxu0 %v62_v52  ;;  %v184_v17 = vld [vmem:[%s1748_s1 + $0x3e0] sm:$0xff]  ;;  %v134_v18 = vld [vmem:[%s1748_s1 + $0x250] sm:$0xff]  ;;  %v151_v19 = vld [vmem:[%s1748_s1 + $0x2d8] sm:$0xff] }
  0x1d   :  { %402 = vmatpush.msra.mxu3 %v111_v51  ;;  %380 = vmatpush.msra.mxu2 %v94_v53  ;;  %v166_v20 = vld [vmem:[%s1748_s1 + $0x350] sm:$0xff]  ;;  %v183_v21 = vld [vmem:[%s1748_s1 + $0x3d8] sm:$0xff]  ;;  %v133_v22 = vld [vmem:[%s1748_s1 + $0x248] sm:$0xff] }
  0x1e   :  { %357 = vmatpush.msra.mxu1 %v78_v54  ;;  %335 = vmatpush.msra.mxu0 %v61_v56  ;;  %v150_v23 = vld [vmem:[%s1748_s1 + $0x2d0] sm:$0xff]  ;;  %v165_v24 = vld [vmem:[%s1748_s1 + $0x348] sm:$0xff]  ;;  %v132_v26 = vld [vmem:[%s1748_s1 + $0x240] sm:$0xff] }
  0x1f   :  { %403 = vmatpush.msra.mxu3 %v110_v55  ;;  %381 = vmatpush.msra.mxu2 %v93_v57  ;;  %v182_v25 = vld [vmem:[%s1748_s1 + $0x3d0] sm:$0xff]  ;;  %v149_v27 = vld [vmem:[%s1748_s1 + $0x2c8] sm:$0xff]  ;;  %v164_v28 = vld [vmem:[%s1748_s1 + $0x340] sm:$0xff] }
  0x20   :  { %358 = vmatpush.msra.mxu1 %v77_v58  ;;  %336 = vmatpush.msra.mxu0 %v60_v60  ;;  %v181_v29 = vld [vmem:[%s1748_s1 + $0x3c8] sm:$0xff]  ;;  %v131_v30 = vld [vmem:[%s1748_s1 + $0x238] sm:$0xff]  ;;  %v148_v31 = vld [vmem:[%s1748_s1 + $0x2c0] sm:$0xff] }
  0x21   :  { %404 = vmatpush.msra.mxu3 %v109_v59  ;;  %382 = vmatpush.msra.mxu2 %v92_v61  ;;  %v163_v32 = vld [vmem:[%s1748_s1 + $0x338] sm:$0xff]  ;;  %v180_v33 = vld [vmem:[%s1748_s1 + $0x3c0] sm:$0xff]  ;;  %v130_v34 = vld [vmem:[%s1748_s1 + $0x230] sm:$0xff] }
  0x22   :  { %413 = vmatpush.msrb.mxu0 %v139_v62  ;;  %359 = vmatpush.msra.mxu1 %v76_v0  ;;  %v147_v35 = vld [vmem:[%s1748_s1 + $0x2b8] sm:$0xff]  ;;  %v162_v36 = vld [vmem:[%s1748_s1 + $0x330] sm:$0xff]  ;;  %v129_v38 = vld [vmem:[%s1748_s1 + $0x228] sm:$0xff] }
  0x23   :  { %459 = vmatpush.msrb.mxu2 %v171_v63  ;;  %405 = vmatpush.msra.mxu3 %v108_v1  ;;  %v179_v37 = vld [vmem:[%s1748_s1 + $0x3b8] sm:$0xff]  ;;  %v146_v39 = vld [vmem:[%s1748_s1 + $0x2b0] sm:$0xff]  ;;  %v161_v40 = vld [vmem:[%s1748_s1 + $0x328] sm:$0xff] }
  0x24   :  { %414 = vmatpush.msrb.mxu0 %v138_v2  ;;  %436 = vmatpush.msrb.mxu1 %v155_v3  ;;  %v178_v41 = vld [vmem:[%s1748_s1 + $0x3b0] sm:$0xff]  ;;  %v128_v42 = vld [vmem:[%s1748_s1 + $0x220] sm:$0xff]  ;;  %v145_v43 = vld [vmem:[%s1748_s1 + $0x2a8] sm:$0xff] }
  0x25   :  { %460 = vmatpush.msrb.mxu2 %v170_v4  ;;  %482 = vmatpush.msrb.mxu3 %v187_v5  ;;  %v160_v44 = vld [vmem:[%s1748_s1 + $0x320] sm:$0xff]  ;;  %v177_v45 = vld [vmem:[%s1748_s1 + $0x3a8] sm:$0xff]  ;;  %v30_v46 = vld [vmem:[%s1749_s0 + $0x10] sm:$0xff] }
  0x26   :  { %415 = vmatpush.msrb.mxu0 %v137_v6  ;;  %437 = vmatpush.msrb.mxu1 %v154_v7  ;;  %v127_v47 = vld [vmem:[%s1748_s1 + $0x218] sm:$0xff]  ;;  %v144_v48 = vld [vmem:[%s1748_s1 + $0x2a0] sm:$0xff]  ;;  %v126_v53 = vld [vmem:[%s1748_s1 + $0x210] sm:$0xff] }
  0x27   :  { %461 = vmatpush.msrb.mxu2 %v169_v8  ;;  %483 = vmatpush.msrb.mxu3 %v186_v9  ;;  %v159_v49 = vld [vmem:[%s1748_s1 + $0x318] sm:$0xff]  ;;  %v176_v50 = vld [vmem:[%s1748_s1 + $0x3a0] sm:$0xff]  ;;  %v158_v55 = vld [vmem:[%s1748_s1 + $0x310] sm:$0xff] }
  0x28   :  { %416 = vmatpush.msrb.mxu0 %v136_v10  ;;  %438 = vmatpush.msrb.mxu1 %v153_v11  ;;  %v28_v51 = vld [vmem:[%s1749_s0] sm:$0xff]  ;;  %v31_v52 = vld [vmem:[%s1749_s0 + $0x18] sm:$0xff]  ;;  %v29_v57 = vld [vmem:[%s1749_s0 + $0x8] sm:$0xff] }
  0x29   :  { %462 = vmatpush.msrb.mxu2 %v168_v12  ;;  %484 = vmatpush.msrb.mxu3 %v185_v13  ;;  %v143_v54 = vld [vmem:[%s1748_s1 + $0x298] sm:$0xff]  ;;  %v125_v58 = vld [vmem:[%s1748_s1 + $0x208] sm:$0xff]  ;;  %v142_v59 = vld [vmem:[%s1748_s1 + $0x290] sm:$0xff] }
  0x2a   :  { %417 = vmatpush.msrb.mxu0 %v135_v14  ;;  %439 = vmatpush.msrb.mxu1 %v152_v15  ;;  %v175_v56 = vld [vmem:[%s1748_s1 + $0x398] sm:$0xff]  ;;  %v157_v60 = vld [vmem:[%s1748_s1 + $0x308] sm:$0xff]  ;;  %v174_v61 = vld [vmem:[%s1748_s1 + $0x390] sm:$0xff] }
  0x2b   :  { %463 = vmatpush.msrb.mxu2 %v167_v16  ;;  %485 = vmatpush.msrb.mxu3 %v184_v17  ;;  %v124_v62 = vld [vmem:[%s1748_s1 + $0x200] sm:$0xff]  ;;  %v141_v63 = vld [vmem:[%s1748_s1 + $0x288] sm:$0xff]  ;;  %v46_v2 = vld [vmem:[%s1749_s0 + $0x90] sm:$0xff] }
  0x2c   :  { %418 = vmatpush.msrb.mxu0 %v134_v18  ;;  %440 = vmatpush.msrb.mxu1 %v151_v19  ;;  %v156_v0 = vld [vmem:[%s1748_s1 + $0x300] sm:$0xff]  ;;  %v173_v1 = vld [vmem:[%s1748_s1 + $0x388] sm:$0xff]  ;;  %v203_v3 = vld [vmem:[%s1748_s1 + $0x478] sm:$0xff] }
  0x2d   :  { %464 = vmatpush.msrb.mxu2 %v166_v20  ;;  %486 = vmatpush.msrb.mxu3 %v183_v21  ;;  %v235_v4 = vld [vmem:[%s1748_s1 + $0x578] sm:$0xff]  ;;  %v140_v5 = vld [vmem:[%s1748_s1 + $0x280] sm:$0xff]  ;;  %v202_v9 = vld [vmem:[%s1748_s1 + $0x470] sm:$0xff] }
  0x2e   :  { %419 = vmatpush.msrb.mxu0 %v133_v22  ;;  %441 = vmatpush.msrb.mxu1 %v150_v23  ;;  %v172_v6 = vld [vmem:[%s1748_s1 + $0x380] sm:$0xff]  ;;  %v47_v8 = vld [vmem:[%s1749_s0 + $0x98] sm:$0xff]  ;;  %v234_v11 = vld [vmem:[%s1748_s1 + $0x570] sm:$0xff] }
  0x2f   :  { %465 = vmatpush.msrb.mxu2 %v165_v24  ;;  %487 = vmatpush.msrb.mxu3 %v182_v25  ;;  %v44_v7 = vld [vmem:[%s1749_s0 + $0x80] sm:$0xff]  ;;  %v219_v10 = vld [vmem:[%s1748_s1 + $0x4f8] sm:$0xff]  ;;  %v45_v13 = vld [vmem:[%s1749_s0 + $0x88] sm:$0xff] }
  0x30   :  { %420 = vmatpush.msrb.mxu0 %v132_v26  ;;  %442 = vmatpush.msrb.mxu1 %v149_v27  ;;  %v251_v12 = vld [vmem:[%s1748_s1 + $0x5f8] sm:$0xff]  ;;  %v201_v14 = vld [vmem:[%s1748_s1 + $0x468] sm:$0xff]  ;;  %v218_v15 = vld [vmem:[%s1748_s1 + $0x4f0] sm:$0xff] }
  0x31   :  { %466 = vmatpush.msrb.mxu2 %v164_v28  ;;  %488 = vmatpush.msrb.mxu3 %v181_v29  ;;  %v233_v16 = vld [vmem:[%s1748_s1 + $0x568] sm:$0xff]  ;;  %v250_v17 = vld [vmem:[%s1748_s1 + $0x5f0] sm:$0xff]  ;;  %v200_v18 = vld [vmem:[%s1748_s1 + $0x460] sm:$0xff] }
  0x32   :  { %421 = vmatpush.msrb.mxu0 %v131_v30  ;;  %443 = vmatpush.msrb.mxu1 %v148_v31  ;;  %v217_v19 = vld [vmem:[%s1748_s1 + $0x4e8] sm:$0xff]  ;;  %v232_v20 = vld [vmem:[%s1748_s1 + $0x560] sm:$0xff]  ;;  %v34_v22 = vld [vmem:[%s1749_s0 + $0x30] sm:$0xff] }
  0x33   :  { %467 = vmatpush.msrb.mxu2 %v163_v32  ;;  %489 = vmatpush.msrb.mxu3 %v180_v33  ;;  %v249_v21 = vld [vmem:[%s1748_s1 + $0x5e8] sm:$0xff]  ;;  %v199_v23 = vld [vmem:[%s1748_s1 + $0x458] sm:$0xff]  ;;  %v216_v24 = vld [vmem:[%s1748_s1 + $0x4e0] sm:$0xff] }
  0x34   :  { %422 = vmatpush.msrb.mxu0 %v130_v34  ;;  %444 = vmatpush.msrb.mxu1 %v147_v35  ;;  %v231_v25 = vld [vmem:[%s1748_s1 + $0x558] sm:$0xff]  ;;  %v248_v26 = vld [vmem:[%s1748_s1 + $0x5e0] sm:$0xff]  ;;  %v198_v29 = vld [vmem:[%s1748_s1 + $0x450] sm:$0xff] }
  0x35   :  { %468 = vmatpush.msrb.mxu2 %v162_v36  ;;  %490 = vmatpush.msrb.mxu3 %v179_v37  ;;  %v32_v27 = vld [vmem:[%s1749_s0 + $0x20] sm:$0xff]  ;;  %v35_v28 = vld [vmem:[%s1749_s0 + $0x38] sm:$0xff]  ;;  %v230_v31 = vld [vmem:[%s1748_s1 + $0x550] sm:$0xff] }
  0x36   :  { %423 = vmatpush.msrb.mxu0 %v129_v38  ;;  %445 = vmatpush.msrb.mxu1 %v146_v39  ;;  %v215_v30 = vld [vmem:[%s1748_s1 + $0x4d8] sm:$0xff]  ;;  %v33_v33 = vld [vmem:[%s1749_s0 + $0x28] sm:$0xff]  ;;  %v214_v35 = vld [vmem:[%s1748_s1 + $0x4d0] sm:$0xff] }
  0x37   :  { %469 = vmatpush.msrb.mxu2 %v161_v40  ;;  %491 = vmatpush.msrb.mxu3 %v178_v41  ;;  %v247_v32 = vld [vmem:[%s1748_s1 + $0x5d8] sm:$0xff]  ;;  %v197_v34 = vld [vmem:[%s1748_s1 + $0x448] sm:$0xff]  ;;  %v246_v37 = vld [vmem:[%s1748_s1 + $0x5d0] sm:$0xff] }
  0x38   :  { %424 = vmatpush.msrb.mxu0 %v128_v42  ;;  %446 = vmatpush.msrb.mxu1 %v145_v43  ;;  %v229_v36 = vld [vmem:[%s1748_s1 + $0x548] sm:$0xff]  ;;  %v196_v38 = vld [vmem:[%s1748_s1 + $0x440] sm:$0xff]  ;;  %v195_v42 = vld [vmem:[%s1748_s1 + $0x438] sm:$0xff] }
  0x39   :  { %470 = vmatpush.msrb.mxu2 %v160_v44  ;;  %492 = vmatpush.msrb.mxu3 %v177_v45  ;;  %v213_v39 = vld [vmem:[%s1748_s1 + $0x4c8] sm:$0xff]  ;;  %v228_v40 = vld [vmem:[%s1748_s1 + $0x540] sm:$0xff]  ;;  %v227_v44 = vld [vmem:[%s1748_s1 + $0x538] sm:$0xff] }
  0x3a   :  { %383 = vmatmul.f32.vlgmr.msra.gmra.mxu2 %v30_v46  ;;  %425 = vmatpush.msrb.mxu0 %v127_v47  ;;  %v245_v41 = vld [vmem:[%s1748_s1 + $0x5c8] sm:$0xff]  ;;  %v212_v43 = vld [vmem:[%s1748_s1 + $0x4c0] sm:$0xff]  ;;  %v194_v46 = vld [vmem:[%s1748_s1 + $0x430] sm:$0xff] }
  0x3b   :  { %447 = vmatpush.msrb.mxu1 %v144_v48  ;;  %471 = vmatpush.msrb.mxu2 %v159_v49  ;;  %v244_v45 = vld [vmem:[%s1748_s1 + $0x5c0] sm:$0xff]  ;;  %v211_v47 = vld [vmem:[%s1748_s1 + $0x4b8] sm:$0xff]  ;;  %v226_v48 = vld [vmem:[%s1748_s1 + $0x530] sm:$0xff] }
  0x3c   :  { %493 = vmatpush.msrb.mxu3 %v176_v50  ;;  %337 = vmatmul.f32.vlgmr.msra.gmra.mxu0 %v28_v51  ;;  %v243_v49 = vld [vmem:[%s1748_s1 + $0x5b8] sm:$0xff]  ;;  %v193_v50 = vld [vmem:[%s1748_s1 + $0x428] sm:$0xff]  ;;  %v210_v51 = vld [vmem:[%s1748_s1 + $0x4b0] sm:$0xff] }
  0x3d   :  { %406 = vmatmul.f32.vlgmr.msra.gmra.mxu3 %v31_v52  ;;  %426 = vmatpush.msrb.mxu0 %v126_v53  ;;  %v225_v52 = vld [vmem:[%s1748_s1 + $0x528] sm:$0xff]  ;;  %v242_v53 = vld [vmem:[%s1748_s1 + $0x5b0] sm:$0xff] }
  0x3e   :  { %448 = vmatpush.msrb.mxu1 %v143_v54  ;;  %472 = vmatpush.msrb.mxu2 %v158_v55  ;;  %v192_v54 = vld [vmem:[%s1748_s1 + $0x420] sm:$0xff]  ;;  %v209_v55 = vld [vmem:[%s1748_s1 + $0x4a8] sm:$0xff] }
  0x3f   :  { %494 = vmatpush.msrb.mxu3 %v175_v56  ;;  %360 = vmatmul.f32.vlgmr.msra.gmra.mxu1 %v29_v57  ;;  %v224_v56 = vld [vmem:[%s1748_s1 + $0x520] sm:$0xff]  ;;  %v241_v57 = vld [vmem:[%s1748_s1 + $0x5a8] sm:$0xff] }
  0x40   :  { %427 = vmatpush.msrb.mxu0 %v125_v58  ;;  %449 = vmatpush.msrb.mxu1 %v142_v59  ;;  %v48_v58 = vld [vmem:[%s1749_s0 + $0xa0] sm:$0xff]  ;;  %v50_v59 = vld [vmem:[%s1749_s0 + $0xb0] sm:$0xff] }
  0x41   :  { %473 = vmatpush.msrb.mxu2 %v157_v60  ;;  %495 = vmatpush.msrb.mxu3 %v174_v61  ;;  %v191_v60 = vld [vmem:[%s1748_s1 + $0x418] sm:$0xff]  ;;  %v208_v61 = vld [vmem:[%s1748_s1 + $0x4a0] sm:$0xff] }
  0x42   :  { %428 = vmatpush.msrb.mxu0 %v124_v62  ;;  %450 = vmatpush.msrb.mxu1 %v141_v63  ;;  %v223_v62 = vld [vmem:[%s1748_s1 + $0x518] sm:$0xff]  ;;  %v240_v63 = vld [vmem:[%s1748_s1 + $0x5a0] sm:$0xff] }
  0x43   :  { %474 = vmatpush.msrb.mxu2 %v156_v0  ;;  %496 = vmatpush.msrb.mxu3 %v173_v1  ;;  %v49_v0 = vld [vmem:[%s1749_s0 + $0xa8] sm:$0xff]  ;;  %v51_v1 = vld [vmem:[%s1749_s0 + $0xb8] sm:$0xff] }
  0x44   :  { %386 = vmatmul.f32.gmra.mxu2 %v46_v2  ;;  %505 = vmatpush.msra.mxu0 %v203_v3  ;;  %v190_v2 = vld [vmem:[%s1748_s1 + $0x410] sm:$0xff]  ;;  %v207_v3 = vld [vmem:[%s1748_s1 + $0x498] sm:$0xff] }
  0x45   :  { %551 = vmatpush.msra.mxu2 %v235_v4  ;;  %451 = vmatpush.msrb.mxu1 %v140_v5  ;;  %v222_v4 = vld [vmem:[%s1748_s1 + $0x510] sm:$0xff]  ;;  %v239_v5 = vld [vmem:[%s1748_s1 + $0x598] sm:$0xff] }
  0x46   :  { %497 = vmatpush.msrb.mxu3 %v172_v6  ;;  %340 = vmatmul.f32.gmra.mxu0 %v44_v7  ;;  %v189_v6 = vld [vmem:[%s1748_s1 + $0x408] sm:$0xff]  ;;  %v206_v7 = vld [vmem:[%s1748_s1 + $0x490] sm:$0xff] }
  0x47   :  { %409 = vmatmul.f32.gmra.mxu3 %v47_v8  ;;  %506 = vmatpush.msra.mxu0 %v202_v9  ;;  %v221_v8 = vld [vmem:[%s1748_s1 + $0x508] sm:$0xff]  ;;  %v238_v9 = vld [vmem:[%s1748_s1 + $0x590] sm:$0xff] }
  0x48   :  { %528 = vmatpush.msra.mxu1 %v219_v10  ;;  %552 = vmatpush.msra.mxu2 %v234_v11  ;;  %v188_v10 = vld [vmem:[%s1748_s1 + $0x400] sm:$0xff]  ;;  %v205_v11 = vld [vmem:[%s1748_s1 + $0x488] sm:$0xff] }
  0x49   :  { %574 = vmatpush.msra.mxu3 %v251_v12  ;;  %363 = vmatmul.f32.gmra.mxu1 %v45_v13  ;;  %v220_v12 = vld [vmem:[%s1748_s1 + $0x500] sm:$0xff]  ;;  %v237_v13 = vld [vmem:[%s1748_s1 + $0x588] sm:$0xff] }
  0x4a   :  { %507 = vmatpush.msra.mxu0 %v201_v14  ;;  %529 = vmatpush.msra.mxu1 %v218_v15  ;;  %v36_v14 = vld [vmem:[%s1749_s0 + $0x40] sm:$0xff]  ;;  %v38_v15 = vld [vmem:[%s1749_s0 + $0x50] sm:$0xff] }
  0x4b   :  { %553 = vmatpush.msra.mxu2 %v233_v16  ;;  %575 = vmatpush.msra.mxu3 %v250_v17  ;;  %v267_v16 = vld [vmem:[%s1748_s1 + $0x678] sm:$0xff] }
  0x4c   :  { %508 = vmatpush.msra.mxu0 %v200_v18  ;;  %530 = vmatpush.msra.mxu1 %v217_v19  ;;  %v299_v17 = vld [vmem:[%s1748_s1 + $0x778] sm:$0xff]  ;;  %v204_v18 = vld [vmem:[%s1748_s1 + $0x480] sm:$0xff] }
  0x4d   :  { %554 = vmatpush.msra.mxu2 %v232_v20  ;;  %576 = vmatpush.msra.mxu3 %v249_v21  ;;  %v236_v19 = vld [vmem:[%s1748_s1 + $0x580] sm:$0xff]  ;;  %v37_v20 = vld [vmem:[%s1749_s0 + $0x48] sm:$0xff]  ;;  %v39_v21 = vld [vmem:[%s1749_s0 + $0x58] sm:$0xff] }
  0x4e   :  { %475 = vmatmul.f32.vlgmr.msrb.gmra.mxu2 %v34_v22  ;;  %509 = vmatpush.msra.mxu0 %v199_v23  ;;  %v266_v22 = vld [vmem:[%s1748_s1 + $0x670] sm:$0xff]  ;;  %v283_v23 = vld [vmem:[%s1748_s1 + $0x6f8] sm:$0xff] }
  0x4f   :  { %531 = vmatpush.msra.mxu1 %v216_v24  ;;  %555 = vmatpush.msra.mxu2 %v231_v25  ;;  %v298_v24 = vld [vmem:[%s1748_s1 + $0x770] sm:$0xff]  ;;  %v309_v25 = vld [vmem:[%s1748_s1 + $0x7c8] sm:$0xff] }
  0x50   :  { %577 = vmatpush.msra.mxu3 %v248_v26  ;;  %429 = vmatmul.f32.vlgmr.msrb.gmra.mxu0 %v32_v27  ;;  %v265_v26 = vld [vmem:[%s1748_s1 + $0x668] sm:$0xff]  ;;  %v282_v27 = vld [vmem:[%s1748_s1 + $0x6f0] sm:$0xff] }
  0x51   :  { %498 = vmatmul.f32.vlgmr.msrb.gmra.mxu3 %v35_v28  ;;  %510 = vmatpush.msra.mxu0 %v198_v29  ;;  %v297_v28 = vld [vmem:[%s1748_s1 + $0x768] sm:$0xff]  ;;  %v308_v29 = vld [vmem:[%s1748_s1 + $0x7c0] sm:$0xff] }
  0x52   :  { %532 = vmatpush.msra.mxu1 %v215_v30  ;;  %556 = vmatpush.msra.mxu2 %v230_v31  ;;  %v264_v30 = vld [vmem:[%s1748_s1 + $0x660] sm:$0xff]  ;;  %v281_v31 = vld [vmem:[%s1748_s1 + $0x6e8] sm:$0xff] }
  0x53   :  { %578 = vmatpush.msra.mxu3 %v247_v32  ;;  %452 = vmatmul.f32.vlgmr.msrb.gmra.mxu1 %v33_v33  ;;  %v296_v32 = vld [vmem:[%s1748_s1 + $0x760] sm:$0xff] }
  0x54   :  { %511 = vmatpush.msra.mxu0 %v197_v34  ;;  %533 = vmatpush.msra.mxu1 %v214_v35  ;;  %v52_v33 = vld [vmem:[%s1749_s0 + $0xc0] sm:$0xff]  ;;  %v54_v34 = vld [vmem:[%s1749_s0 + $0xd0] sm:$0xff]  ;;  %v263_v35 = vld [vmem:[%s1748_s1 + $0x658] sm:$0xff] }
  0x55   :  { %557 = vmatpush.msra.mxu2 %v229_v36  ;;  %579 = vmatpush.msra.mxu3 %v246_v37  ;;  %v280_v36 = vld [vmem:[%s1748_s1 + $0x6e0] sm:$0xff]  ;;  %v295_v37 = vld [vmem:[%s1748_s1 + $0x758] sm:$0xff] }
  0x56   :  { %512 = vmatpush.msra.mxu0 %v196_v38  ;;  %534 = vmatpush.msra.mxu1 %v213_v39  ;;  %v55_v38 = vld [vmem:[%s1749_s0 + $0xd8] sm:$0xff]  ;;  %v262_v39 = vld [vmem:[%s1748_s1 + $0x650] sm:$0xff] }
  0x57   :  { %558 = vmatpush.msra.mxu2 %v228_v40  ;;  %580 = vmatpush.msra.mxu3 %v245_v41  ;;  %v279_v40 = vld [vmem:[%s1748_s1 + $0x6d8] sm:$0xff]  ;;  %v294_v41 = vld [vmem:[%s1748_s1 + $0x750] sm:$0xff] }
  0x58   :  { %513 = vmatpush.msra.mxu0 %v195_v42  ;;  %535 = vmatpush.msra.mxu1 %v212_v43  ;;  %v53_v42 = vld [vmem:[%s1749_s0 + $0xc8] sm:$0xff] }
  0x59   :  { %559 = vmatpush.msra.mxu2 %v227_v44  ;;  %581 = vmatpush.msra.mxu3 %v244_v45  ;;  %v261_v43 = vld [vmem:[%s1748_s1 + $0x648] sm:$0xff]  ;;  %v278_v44 = vld [vmem:[%s1748_s1 + $0x6d0] sm:$0xff] }
  0x5a   :  { %514 = vmatpush.msra.mxu0 %v194_v46  ;;  %536 = vmatpush.msra.mxu1 %v211_v47  ;;  %v293_v45 = vld [vmem:[%s1748_s1 + $0x748] sm:$0xff]  ;;  %v260_v46 = vld [vmem:[%s1748_s1 + $0x640] sm:$0xff]  ;;  %v307_v47 = vld [vmem:[%s1748_s1 + $0x7b8] sm:$0xff] }
  0x5b   :  { %560 = vmatpush.msra.mxu2 %v226_v48  ;;  %582 = vmatpush.msra.mxu3 %v243_v49  ;;  %v277_v48 = vld [vmem:[%s1748_s1 + $0x6c8] sm:$0xff]  ;;  %v292_v49 = vld [vmem:[%s1748_s1 + $0x740] sm:$0xff] }
  0x5c   :  { %515 = vmatpush.msra.mxu0 %v193_v50  ;;  %537 = vmatpush.msra.mxu1 %v210_v51  ;;  %v259_v50 = vld [vmem:[%s1748_s1 + $0x638] sm:$0xff]  ;;  %v306_v51 = vld [vmem:[%s1748_s1 + $0x7b0] sm:$0xff] }
  0x5d   :  { %561 = vmatpush.msra.mxu2 %v225_v52  ;;  %583 = vmatpush.msra.mxu3 %v242_v53  ;;  %v276_v52 = vld [vmem:[%s1748_s1 + $0x6c0] sm:$0xff]  ;;  %v291_v53 = vld [vmem:[%s1748_s1 + $0x738] sm:$0xff] }
  0x5e   :  { %516 = vmatpush.msra.mxu0 %v192_v54  ;;  %538 = vmatpush.msra.mxu1 %v209_v55  ;;  %v258_v54 = vld [vmem:[%s1748_s1 + $0x630] sm:$0xff]  ;;  %v305_v55 = vld [vmem:[%s1748_s1 + $0x7a8] sm:$0xff] }
  0x5f   :  { %562 = vmatpush.msra.mxu2 %v224_v56  ;;  %584 = vmatpush.msra.mxu3 %v241_v57  ;;  %v275_v56 = vld [vmem:[%s1748_s1 + $0x6b8] sm:$0xff]  ;;  %v290_v57 = vld [vmem:[%s1748_s1 + $0x730] sm:$0xff] }
  0x60   :  { %432 = vmatmul.f32.gmra.mxu0 %v48_v58  ;;  %478 = vmatmul.f32.gmra.mxu2 %v50_v59  ;;  %v257_v58 = vld [vmem:[%s1748_s1 + $0x628] sm:$0xff]  ;;  %v304_v59 = vld [vmem:[%s1748_s1 + $0x7a0] sm:$0xff] }
  0x61   :  { %517 = vmatpush.msra.mxu0 %v191_v60  ;;  %539 = vmatpush.msra.mxu1 %v208_v61  ;;  %v274_v60 = vld [vmem:[%s1748_s1 + $0x6b0] sm:$0xff]  ;;  %v289_v61 = vld [vmem:[%s1748_s1 + $0x728] sm:$0xff] }
  0x62   :  { %563 = vmatpush.msra.mxu2 %v223_v62  ;;  %585 = vmatpush.msra.mxu3 %v240_v63  ;;  %v256_v62 = vld [vmem:[%s1748_s1 + $0x620] sm:$0xff]  ;;  %v303_v63 = vld [vmem:[%s1748_s1 + $0x798] sm:$0xff] }
  0x63   :  { %455 = vmatmul.f32.gmra.mxu1 %v49_v0  ;;  %501 = vmatmul.f32.gmra.mxu3 %v51_v1  ;;  %v273_v0 = vld [vmem:[%s1748_s1 + $0x6a8] sm:$0xff]  ;;  %v288_v1 = vld [vmem:[%s1748_s1 + $0x720] sm:$0xff] }
  0x64   :  { %518 = vmatpush.msra.mxu0 %v190_v2  ;;  %540 = vmatpush.msra.mxu1 %v207_v3  ;;  %v255_v2 = vld [vmem:[%s1748_s1 + $0x618] sm:$0xff]  ;;  %v302_v3 = vld [vmem:[%s1748_s1 + $0x790] sm:$0xff] }
  0x65   :  { %564 = vmatpush.msra.mxu2 %v222_v4  ;;  %586 = vmatpush.msra.mxu3 %v239_v5  ;;  %v272_v4 = vld [vmem:[%s1748_s1 + $0x6a0] sm:$0xff]  ;;  %v287_v5 = vld [vmem:[%s1748_s1 + $0x718] sm:$0xff] }
  0x66   :  { %519 = vmatpush.msra.mxu0 %v189_v6  ;;  %541 = vmatpush.msra.mxu1 %v206_v7  ;;  %v254_v6 = vld [vmem:[%s1748_s1 + $0x610] sm:$0xff]  ;;  %v301_v7 = vld [vmem:[%s1748_s1 + $0x788] sm:$0xff] }
  0x67   :  { %565 = vmatpush.msra.mxu2 %v221_v8  ;;  %587 = vmatpush.msra.mxu3 %v238_v9  ;;  %v271_v8 = vld [vmem:[%s1748_s1 + $0x698] sm:$0xff]  ;;  %v286_v9 = vld [vmem:[%s1748_s1 + $0x710] sm:$0xff] }
  0x68   :  { %520 = vmatpush.msra.mxu0 %v188_v10  ;;  %542 = vmatpush.msra.mxu1 %v205_v11  ;;  %v253_v10 = vld [vmem:[%s1748_s1 + $0x608] sm:$0xff]  ;;  %v300_v11 = vld [vmem:[%s1748_s1 + $0x780] sm:$0xff] }
  0x69   :  { %566 = vmatpush.msra.mxu2 %v220_v12  ;;  %588 = vmatpush.msra.mxu3 %v237_v13  ;;  %v270_v12 = vld [vmem:[%s1748_s1 + $0x690] sm:$0xff]  ;;  %v285_v13 = vld [vmem:[%s1748_s1 + $0x708] sm:$0xff] }
  0x6a   :  { %521 = vmatmul.f32.vlgmr.msra.gmra.mxu0 %v36_v14  ;;  %567 = vmatmul.f32.vlgmr.msra.gmra.mxu2 %v38_v15  ;;  %v252_v14 = vld [vmem:[%s1748_s1 + $0x600] sm:$0xff]  ;;  %v43_v15 = vld [vmem:[%s1749_s0 + $0x78] sm:$0xff] }
  0x6b   :  { %597 = vmatpush.msrb.mxu0 %v267_v16  ;;  %643 = vmatpush.msrb.mxu2 %v299_v17  ;;  %v269_v16 = vld [vmem:[%s1748_s1 + $0x688] sm:$0xff]  ;;  %v284_v17 = vld [vmem:[%s1748_s1 + $0x700] sm:$0xff] }
  0x6c   :  { %543 = vmatpush.msra.mxu1 %v204_v18  ;;  %589 = vmatpush.msra.mxu3 %v236_v19  ;;  %v40_v18 = vld [vmem:[%s1749_s0 + $0x60] sm:$0xff]  ;;  %v42_v19 = vld [vmem:[%s1749_s0 + $0x70] sm:$0xff] }
  0x6d   :  { %544 = vmatmul.f32.vlgmr.msra.gmra.mxu1 %v37_v20  ;;  %590 = vmatmul.f32.vlgmr.msra.gmra.mxu3 %v39_v21  ;;  %v268_v20 = vld [vmem:[%s1748_s1 + $0x680] sm:$0xff]  ;;  %v41_v21 = vld [vmem:[%s1749_s0 + $0x68] sm:$0xff] }
  0x6e   :  { %598 = vmatpush.msrb.mxu0 %v266_v22  ;;  %620 = vmatpush.msrb.mxu1 %v283_v23  ;;  %v59_v22 = vld [vmem:[%s1749_s0 + $0xf8] sm:$0xff]  ;;  %v56_v23 = vld [vmem:[%s1749_s0 + $0xe0] sm:$0xff] }
  0x6f   :  { %644 = vmatpush.msrb.mxu2 %v298_v24  ;;  %672 = vmatpush.msrb.mxu3 %v309_v25  ;;  %v58_v24 = vld [vmem:[%s1749_s0 + $0xf0] sm:$0xff]  ;;  %v57_v25 = vld [vmem:[%s1749_s0 + $0xe8] sm:$0xff] }
  0x70   :  { %599 = vmatpush.msrb.mxu0 %v265_v26  ;;  %621 = vmatpush.msrb.mxu1 %v282_v27 }
  0x71   :  { %645 = vmatpush.msrb.mxu2 %v297_v28  ;;  %673 = vmatpush.msrb.mxu3 %v308_v29 }
  0x72   :  { %600 = vmatpush.msrb.mxu0 %v264_v30  ;;  %622 = vmatpush.msrb.mxu1 %v281_v31  ;;  %v692_v30 = vld [vmem:[%s1752_s3 + $0x8] sm:$0xf] }
  0x73   :  { %646 = vmatpush.msrb.mxu2 %v296_v32  ;;  %524 = vmatmul.f32.gmra.mxu0 %v52_v33  ;;  %v823_v32 = vld [vmem:[%s1750_s2] ss:$0 sm:$0xff] }
  0x74   :  { %570 = vmatmul.f32.gmra.mxu2 %v54_v34  ;;  %601 = vmatpush.msrb.mxu0 %v263_v35 }
  0x75   :  { %623 = vmatpush.msrb.mxu1 %v280_v36  ;;  %647 = vmatpush.msrb.mxu2 %v295_v37 }
  0x76   :  { %593 = vmatmul.f32.gmra.mxu3 %v55_v38  ;;  %602 = vmatpush.msrb.mxu0 %v262_v39 }
  0x77   :  { %624 = vmatpush.msrb.mxu1 %v279_v40  ;;  %648 = vmatpush.msrb.mxu2 %v294_v41 }
  0x78   :  { %547 = vmatmul.f32.gmra.mxu1 %v53_v42  ;;  %603 = vmatpush.msrb.mxu0 %v261_v43 }
  0x79   :  { %625 = vmatpush.msrb.mxu1 %v278_v44  ;;  %649 = vmatpush.msrb.mxu2 %v293_v45 }
  0x7a   :  { %604 = vmatpush.msrb.mxu0 %v260_v46  ;;  %674 = vmatpush.msrb.mxu3 %v307_v47  ;;  %v691_v47 = vld [vmem:[%s1752_s3] sm:$0xff] }
  0x7b   :  { %626 = vmatpush.msrb.mxu1 %v277_v48  ;;  %650 = vmatpush.msrb.mxu2 %v292_v49 }
  0x7c   :  { %605 = vmatpush.msrb.mxu0 %v259_v50  ;;  %675 = vmatpush.msrb.mxu3 %v306_v51 }
  0x7d   :  { %627 = vmatpush.msrb.mxu1 %v276_v52  ;;  %651 = vmatpush.msrb.mxu2 %v291_v53 }
  0x7e   :  { %606 = vmatpush.msrb.mxu0 %v258_v54  ;;  %676 = vmatpush.msrb.mxu3 %v305_v55 }
  0x7f   :  { %628 = vmatpush.msrb.mxu1 %v275_v56  ;;  %652 = vmatpush.msrb.mxu2 %v290_v57 }
  0x80   :  { %607 = vmatpush.msrb.mxu0 %v257_v58  ;;  %677 = vmatpush.msrb.mxu3 %v304_v59 }
  0x81   :  { %629 = vmatpush.msrb.mxu1 %v274_v60  ;;  %653 = vmatpush.msrb.mxu2 %v289_v61 }
  0x82   :  { %608 = vmatpush.msrb.mxu0 %v256_v62  ;;  %678 = vmatpush.msrb.mxu3 %v303_v63 }
  0x83   :  { %630 = vmatpush.msrb.mxu1 %v273_v0  ;;  %654 = vmatpush.msrb.mxu2 %v288_v1  ;;  %v733_v1 = vld [vmem:[%s1753_s5] sm:$0xff] }
  0x84   :  { %609 = vmatpush.msrb.mxu0 %v255_v2  ;;  %679 = vmatpush.msrb.mxu3 %v302_v3 }
  0x85   :  { %631 = vmatpush.msrb.mxu1 %v272_v4  ;;  %655 = vmatpush.msrb.mxu2 %v287_v5 }
  0x86   :  { %610 = vmatpush.msrb.mxu0 %v254_v6  ;;  %680 = vmatpush.msrb.mxu3 %v301_v7 }
  0x87   :  { %632 = vmatpush.msrb.mxu1 %v271_v8  ;;  %656 = vmatpush.msrb.mxu2 %v286_v9 }
  0x88   :  { %611 = vmatpush.msrb.mxu0 %v253_v10  ;;  %681 = vmatpush.msrb.mxu3 %v300_v11 }
  0x89   :  { %633 = vmatpush.msrb.mxu1 %v270_v12  ;;  %657 = vmatpush.msrb.mxu2 %v285_v13 }
  0x8a   :  { %612 = vmatpush.msrb.mxu0 %v252_v14  ;;  %813 = vmatmul.msk.f32.vlgmr.msrb.gmra.mxu3 %vm314_vm0, %v43_v15 }
  0x8b   :  { %634 = vmatpush.msrb.mxu1 %v269_v16  ;;  %658 = vmatpush.msrb.mxu2 %v284_v17 }
  0x8c   :  { %613 = vmatmul.f32.vlgmr.msrb.gmra.mxu0 %v40_v18  ;;  %659 = vmatmul.f32.vlgmr.msrb.gmra.mxu2 %v42_v19 }
  0x8d   :  { %635 = vmatpush.msrb.mxu1 %v268_v20  ;;  %815 = vmatpush.msk.msra.mxu3 %vm704_vm1, %v692_v30 }
  0x8e   :  { %636 = vmatmul.f32.vlgmr.msrb.gmra.mxu1 %v41_v21  ;;  %760 = vmatpush.msra.mxu0 %v733_v1 }
  0x8f   :  { %723 = vmatpush.msra.mxu3 %v691_v47  ;;  %822 = vmatpush.msra.mxu1 %v733_v1 }
  0x92   :  { %814 = vmatmul.msk.f32.gmra.mxu3 %vm314_vm0, %v59_v22 }
  0x94   :  { %616 = vmatmul.f32.gmra.mxu0 %v56_v23  ;;  %662 = vmatmul.f32.gmra.mxu2 %v58_v24 }
  0x96   :  { %639 = vmatmul.f32.gmra.mxu1 %v57_v25 }
  0xb9   :  { %v338_v26 = vpop.f32.mrf.mxu0 }
  0xba   :  { %v339_v35 = vadd.f32 %v823_v32, %v338_v26 }
  0xbc   :  { %v361_v27 = vpop.f32.mrf.mxu1 }
  0xbd   :  { %v384_v29 = vpop.f32.mrf.mxu2  ;;  %v362_v37 = vadd.f32 %v361_v27, %v339_v35 }
  0xbf   :  { %v385_v41 = vadd.f32 %v384_v29, %v362_v37 }
  0xc0   :  { %v407_v28 = vpop.f32.mrf.mxu3 }
  0xc1   :  { %v408_v45 = vadd.f32 %v407_v28, %v385_v41 }
  0xc3   :  { %v341_v31 = vpop.f32.mrf.mxu0 }
  0xc4   :  { %v342_v38 = vadd.f32 %v823_v32, %v341_v31  ;;  %v12_v32 = vstv %s1754_s6 }
  0xc5   :  { %13 = vst [vmem:[#allocation2] sm:$0x1] %v12_v32 }
  0xc6   :  { %v364_v33 = vpop.f32.mrf.mxu1 }
  0xc7   :  { %v387_v36 = vpop.f32.mrf.mxu2  ;;  %v365_v42 = vadd.f32 %v364_v33, %v342_v38  ;;  %v824_v33 = vld [vmem:[%s1751_s4] ss:$0 sm:$0xff] }
  0xc9   :  { %v388_v46 = vadd.f32 %v387_v36, %v365_v42 }
  0xca   :  { %v410_v34 = vpop.f32.mrf.mxu3 }
  0xcb   :  { %v411_v50 = vadd.f32 %v410_v34, %v388_v46 }
  0xcd   :  { %v430_v39 = vpop.f32.mrf.mxu0 }
  0xce   :  { %v431_v51 = vadd.f32 %v430_v39, %v408_v45 }
  0xd0   :  { %v453_v40 = vpop.f32.mrf.mxu1 }
  0xd1   :  { %v476_v44 = vpop.f32.mrf.mxu2  ;;  %v454_v54 = vadd.f32 %v453_v40, %v431_v51  ;;  %v825_v40 = vld [vmem:[#allocation2] ss:$0 sm:$0xff] }
  0xd3   :  { %v477_v57 = vadd.f32 %v476_v44, %v454_v54 }
  0xd4   :  { %v499_v43 = vpop.f32.mrf.mxu3 }
  0xd5   :  { %v500_v61 = vadd.f32 %v499_v43, %v477_v57 }
  0xdd   :  { %v433_v48 = vpop.f32.mrf.mxu0 }
  0xde   :  { %v434_v55 = vadd.f32 %v433_v48, %v411_v50 }
  0xe0   :  { %v456_v49 = vpop.f32.mrf.mxu1 }
  0xe1   :  { %v457_v58 = vadd.f32 %v456_v49, %v434_v55 }
  0xe3   :  { %v479_v53 = vpop.f32.mrf.mxu2 }
  0xe4   :  { %v480_v62 = vadd.f32 %v479_v53, %v457_v58 }
  0xe6   :  { %v502_v52 = vpop.f32.mrf.mxu3 }
  0xe7   :  { %v522_v56 = vpop.f32.mrf.mxu0  ;;  %v503_v2 = vadd.f32 %v502_v52, %v480_v62 }
  0xe8   :  { %v523_v0 = vadd.f32 %v522_v56, %v500_v61 }
  0xea   :  { %v545_v59 = vpop.f32.mrf.mxu1 }
  0xeb   :  { %v546_v4 = vadd.f32 %v545_v59, %v523_v0 }
  0xed   :  { %v568_v63 = vpop.f32.mrf.mxu2 }
  0xee   :  { %v569_v6 = vadd.f32 %v568_v63, %v546_v4 }
  0xf0   :  { %v591_v60 = vpop.f32.mrf.mxu3  ;;  %v525_v3 = vpop.f32.mrf.mxu0 }
  0xf1   :  { %v526_v7 = vadd.f32 %v525_v3, %v503_v2  ;;  %v592_v10 = vadd.f32 %v591_v60, %v569_v6 }
  0xf5   :  { %v548_v5 = vpop.f32.mrf.mxu1 }
  0xf6   :  { %v549_v11 = vadd.f32 %v548_v5, %v526_v7 }
  0xf7   :  { %v571_v9 = vpop.f32.mrf.mxu2 }
  0xf8   :  { %v572_v15 = vadd.f32 %v571_v9, %v549_v11 }
  0xf9   :  { %v594_v8 = vpop.f32.mrf.mxu3 }
  0xfa   :  { %v595_v19 = vadd.f32 %v594_v8, %v572_v15 }
 0x109   :  { %v614_v12 = vpop.f32.mrf.mxu0 }
 0x10a   :  { %v615_v13 = vadd.f32 %v614_v12, %v592_v10 }
 0x10b   :  { %v637_v14 = vpop.f32.mrf.mxu1 }
 0x10c   :  { %v638_v17 = vadd.f32 %v637_v14, %v615_v13 }
 0x10d   :  { %v683_v16 = vpop.f32.mrf.mxu3 }
 0x10f   :  { %v660_v18 = vpop.f32.mrf.mxu2 }
 0x110   :  { %v661_v20 = vadd.f32 %v660_v18, %v638_v17 }
 0x111   :  { %v617_v21 = vpop.f32.mrf.mxu0 }
 0x112   :  { %v618_v22 = vadd.f32 %v617_v21, %v595_v19  ;;  %v684_v23 = vadd.f32 %v683_v16, %v661_v20 }
 0x113   :  { %v640_v24 = vpop.f32.mrf.mxu1 }
 0x114   :  { %v689_v25 = vmax.f32 %v684_v23, 0.0  ;;  %v641_v26 = vadd.f32 %v640_v24, %v618_v22 }
 0x115   :  { %v686_v28 = vpop.f32.mrf.mxu3 }
 0x116   :  { %816 = vmatmul.msk.f32.vlgmr.msra.gmra.mxu3 %vm697_vm2, %v689_v25 }
 0x117   :  { %v663_v27 = vpop.f32.mrf.mxu2 }
 0x118   :  { %v664_v29 = vadd.f32 %v663_v27, %v641_v26 }
 0x11a   :  { %v687_v30 = vadd.f32 %v686_v28, %v664_v29 }
 0x11c   :  { %v690_v31 = vmax.f32 %v687_v30, 0.0 }
 0x11e   :  { %817 = vmatmul.msk.f32.gmra.mxu3 %vm697_vm2, %v690_v31 }
 0x199   :  { %v725_v34 = vpop.f32.mrf.mxu3 }
 0x19a   :  { %v726_v35 = vadd.f32 %v824_v33, %v725_v34 }
 0x19c   :  { %v731_v36 = vmax.f32 %v726_v35, 0.0 }
 0x19e   :  { %818 = vmatmul.msk.f32.vlgmr.msra.gmra.mxu0 %vm738_vm3, %v731_v36 }
 0x1a1   :  { %v728_v37 = vpop.f32.mrf.mxu3 }
 0x1a2   :  { %v729_v38 = vadd.f32 %v824_v33, %v728_v37 }
 0x1a4   :  { %v732_v39 = vmax.f32 %v729_v38, 0.0 }
 0x1a6   :  { %819 = vmatmul.msk.f32.vlgmr.msra.gmra.mxu1 %vm738_vm3, %v732_v39 }
 0x21b   :  { %v762_v41 = vpop.f32.mrf.mxu0 }
 0x21c   :  { %v763_v42 = vadd.f32 %v825_v40, %v762_v41 }
 0x21e   :  { %v820_v43 = vmul.f32 -1.442695, %v763_v42 }
 0x220   :  { %826 = vpow2.f32 %v820_v43 }
 0x223   :  { %v765_v44 = vpop.f32.mrf.mxu1 }
 0x224   :  { %v766_v45 = vadd.f32 %v825_v40, %v765_v44 }
 0x226   :  { %v827_v46 = vpop.eup %826  ;;  %v821_v47 = vmul.f32 -1.442695, %v766_v45 }
 0x227   :  { %v774_v48 = vadd.f32 1.0, %v827_v46 }
 0x228   :  { %828 = vpow2.f32 %v821_v47 }
 0x229   :  { %830 = vrcp.f32 %v774_v48  ;;  %v787_v54 = vand.u32 2147483648, %v774_v48  ;;  %v785_v56 = vand.u32 2147483647, %v774_v48  ;;  %vm781_vm5 = vweird.f32 %v774_v48 }
 0x22b   :  { %v788_v59 = vor.u32 1.1754944e-38, %v787_v54  ;;  %vm786_vm8 = vcmp.eq.f32.partialorder %v785_v56, 8.507059e+37 }
 0x22e   :  { %v829_v49 = vpop.eup %828 }
 0x22f   :  { %v831_v50 = vpop.eup %830  ;;  %v775_v51 = vadd.f32 1.0, %v829_v49 }
 0x230   :  { %v777_v52 = vmul.f32 %v831_v50, %v774_v48  ;;  %vm782_vm4 = vweird.f32 %v831_v50 }
 0x231   :  { %832 = vrcp.f32 %v775_v51  ;;  %vm783_vm6 = vmor %vm781_vm5, %vm782_vm4  ;;  %v802_v0 = vand.u32 2147483648, %v775_v51  ;;  %v800_v2 = vand.u32 2147483647, %v775_v51  ;;  %vm796_vm10 = vweird.f32 %v775_v51 }
 0x232   :  { %v778_v53 = vsub.f32 1.0, %v777_v52 }
 0x233   :  { %v803_v4 = vor.u32 1.1754944e-38, %v802_v0  ;;  %vm801_vm12 = vcmp.eq.f32.partialorder %v800_v2, 8.507059e+37 }
 0x234   :  { %v779_v55 = vmul.f32 %v831_v50, %v778_v53 }
 0x236   :  { %v780_v57 = vadd.f32 %v831_v50, %v779_v55 }
 0x237   :  { %v833_v58 = vpop.eup %832 }
 0x238   :  { %v784_v60 = vsel %vm783_vm6, %v831_v50, %v780_v57  ;;  %v792_v61 = vmul.f32 %v833_v58, %v775_v51  ;;  %vm797_vm9 = vweird.f32 %v833_v58 }
 0x239   :  { %v789_v62 = vsel %vm786_vm8, %v788_v59, %v784_v60  ;;  %vm798_vm11 = vmor %vm796_vm10, %vm797_vm9 }
 0x23a   :  { %807 = vst.msk [vmem:[%s1755_s7] sm:$0xff] %vm806_vm7, %v789_v62  ;;  %v793_v63 = vsub.f32 1.0, %v792_v61 }
 0x23c   :  { %v794_v1 = vmul.f32 %v833_v58, %v793_v63 }
 0x23e   :  { %v795_v3 = vadd.f32 %v833_v58, %v794_v1 }
 0x240   :  { %v799_v5 = vsel %vm798_vm11, %v833_v58, %v795_v3 }
 0x241   :  { %v804_v6 = vsel %vm801_vm12, %v803_v4, %v799_v5 }
 0x242   :  { %808 = vst.msk [vmem:[%s1755_s7 + $0x8] sm:$0xff] %vm806_vm7, %v804_v6 }

</bundles_post_ra>
